<compile_context>
chip_gen: v6e
topology: v6e:2x2x1
jax: 0.10.0
libtpu: 0.0.40
codegen_flags: <defaults>
</compile_context>

<pallas_src>
import math

import jax
import jax.numpy as jnp
from jax import lax
from jax.experimental import pallas as pl
from jax.experimental.pallas import tpu as pltpu


def _gelu_tanh(x):
    # GELU with tanh approximation (matches nn.GELU(approximate='tanh')).
    c = math.sqrt(2.0 / math.pi)
    return 0.5 * x * (1.0 + jnp.tanh(c * (x + 0.044715 * x * x * x)))


def _round_up(x, m):
    return ((x + m - 1) // m) * m


def _vmem_capacity_bytes():
    """Per-TensorCore VMEM capacity; conservative fallback if query fails."""
    try:
        info = pltpu.get_tpu_info()
        cap = getattr(info, "vmem_capacity_bytes", None)
        if cap:
            return int(cap)
    except Exception:
        pass
    return 64 << 20  # assume v7x-class (smallest) if unknown


# ----------------------------- kernels --------------------------------------


def _make_resident_kernel(precision):
    """Weights fully VMEM-resident: one fused pass per row tile."""
    def kernel(x_ref, wfc_ref, bfc_ref, wproj_ref, bproj_ref, o_ref):
        h = jnp.dot(x_ref[...], wfc_ref[...],
                    preferred_element_type=jnp.float32, precision=precision)
        h = h + bfc_ref[...]                       # f32 bias add
        g = _gelu_tanh(h)                          # f32 GELU (tanh on EUP)
        out = jnp.dot(g.astype(wproj_ref.dtype), wproj_ref[...],
                      preferred_element_type=jnp.float32, precision=precision)
        o_ref[...] = (out + bproj_ref[...]).astype(o_ref.dtype)
    return kernel


def _make_streaming_kernel(acc_into_out, precision):
    """Hidden dim streamed in chunks (grid axis j); accumulate in f32.

    acc_into_out (static): when the output dtype is f32, accumulate directly
    into the revisited output block instead of a separate VMEM scratch.
    """
    def kernel(x_ref, wfc_ref, bfc_ref, wproj_ref, bproj_ref, o_ref, *scratch):
        j = pl.program_id(1)
        acc_ref = o_ref if acc_into_out else scratch[0]

        @pl.when(j == 0)
        def _init():
            acc_ref[...] = jnp.zeros_like(acc_ref)

        h = jnp.dot(x_ref[...], wfc_ref[...],
                    preferred_element_type=jnp.float32, precision=precision)
        h = h + bfc_ref[...]
        g = _gelu_tanh(h)
        acc_ref[...] += jnp.dot(g.astype(wproj_ref.dtype), wproj_ref[...],
                                preferred_element_type=jnp.float32,
                                precision=precision)

        @pl.when(j == pl.num_programs(1) - 1)
        def _finalize():
            if acc_into_out:
                o_ref[...] = o_ref[...] + bproj_ref[...]
            else:
                o_ref[...] = (acc_ref[...] + bproj_ref[...]).astype(o_ref.dtype)
    return kernel


# --------------------------- VMEM estimates ---------------------------------


def _resident_est(tm, E, H, cb, ob):
    return (2 * tm * E * cb                      # x tile (double-buffered)
            + 2 * tm * E * ob                    # out tile
            + 2 * E * H * cb + 2 * H * E * cb    # weights (conservative 2x)
            + 2 * 8 * _round_up(H, 128) * 4      # b_fc
            + 2 * 8 * _round_up(E, 128) * 4      # b_proj
            + tm * H * 4 + tm * H * cb           # fc f32 + gelu-cast temps
            + tm * E * 4                         # proj f32 result before cast
            + (2 << 20))                         # headroom


def _stream_est(tm, th, E, cb, ob, acc_into_out):
    return (2 * tm * E * cb
            + 2 * tm * E * ob
            + 2 * E * th * cb + 2 * th * E * cb  # weight chunks (double-buf)
            + 2 * 8 * th * 4
            + 2 * 8 * _round_up(E, 128) * 4
            + (0 if acc_into_out else tm * E * 4)
            + tm * th * 4 + tm * th * cb
            + (2 << 20))


# ------------------------------- wrapper -------------------------------------


def mlp_forward(x, w_fc, b_fc, w_proj, b_proj, *,
                compute_dtype=jnp.bfloat16, precision=None,
                force_stream=False):
    """nanoGPT MLP: gelu_tanh(x @ W_fc + b_fc) @ W_proj + b_proj.

    x: (B, T, E). Weights stored (in, out) (transpose of PyTorch Linear).
    compute_dtype: dtype fed to the MXU (bf16 default on all TPU gens);
    accumulation, biases and GELU always stay in f32. Pass jnp.float32 for a
    strict-f32 path (uses Precision.HIGHEST matmuls).
    """
    B, T, E = x.shape
    H = w_fc.shape[1]
    out_dtype = x.dtype

    if compute_dtype is not None:
        x = x.astype(compute_dtype)
        w_fc = w_fc.astype(compute_dtype)
        w_proj = w_proj.astype(compute_dtype)
    cdt = x.dtype
    if precision is None and cdt == jnp.float32:
        # Default MXU precision would lower f32 to reduced-precision passes.
        precision = lax.Precision.HIGHEST

    b_fc2 = b_fc.astype(jnp.float32).reshape(1, H)
    b_proj2 = b_proj.astype(jnp.float32).reshape(1, E)

    M = B * T
    x2d = x.reshape(M, E)
    Mr = _round_up(M, 16)

    cb = jnp.dtype(cdt).itemsize
    ob = jnp.dtype(out_dtype).itemsize

    cap = _vmem_capacity_bytes()
    budget = min(int(0.75 * cap), 56 << 20)  # ~48 MiB on v7x, 56 MiB on v5e/v6e

    tm_candidates = (1024, 512, 256, 128, 64, 32, 16)

    # ---------------- path 1: weights VMEM-resident ----------------
    resident_tm = None
    if not force_stream:
        for c in tm_candidates:
            t = _round_up(min(c, Mr), 16)
            if _resident_est(t, E, H, cb, ob) <= budget:
                resident_tm = t
                break

    if resident_tm is not None:
        tm = resident_tm
        Mp = _round_up(M, tm)
        if Mp != M:
            x2d = jnp.pad(x2d, ((0, Mp - M), (0, 0)))

        out2d = pl.pallas_call(
            _make_resident_kernel(precision),
            out_shape=jax.ShapeDtypeStruct((Mp, E), out_dtype),
            grid_spec=pltpu.PrefetchScalarGridSpec(
                num_scalar_prefetch=0,
                grid=(Mp // tm,),
                in_specs=[
                    pl.BlockSpec((tm, E), lambda i: (i, 0)),   # x rows
                    pl.BlockSpec((E, H), lambda i: (0, 0)),    # W_fc (resident)
                    pl.BlockSpec((1, H), lambda i: (0, 0)),    # b_fc
                    pl.BlockSpec((H, E), lambda i: (0, 0)),    # W_proj (resident)
                    pl.BlockSpec((1, E), lambda i: (0, 0)),    # b_proj
                ],
                out_specs=pl.BlockSpec((tm, E), lambda i: (i, 0)),
            ),
            compiler_params=pltpu.CompilerParams(
                dimension_semantics=("parallel",),
                vmem_limit_bytes=budget,
            ),
        )(x2d, w_fc, b_fc2, w_proj, b_proj2)
        return out2d[:M].reshape(B, T, E)

    # ---------------- path 2: stream the hidden dim ----------------
    acc_into_out = (out_dtype == jnp.float32)
    Hc = _round_up(H, 128)
    tm, th = 16, 128
    found = False
    for c in tm_candidates:                       # prefer big row tiles first
        t = _round_up(min(c, Mr), 16)
        for thc in (2048, 1536, 1024, 512, 256, 128):
            hh = min(thc, Hc)
            if _stream_est(t, hh, E, cb, ob, acc_into_out) <= budget:
                tm, th, found = t, hh, True
                break
        if found:
            break
    # (if nothing "fits" the estimate, fall back to the minimal 16x128 tiles)

    Mp = _round_up(M, tm)
    if Mp != M:
        x2d = jnp.pad(x2d, ((0, Mp - M), (0, 0)))
    Hp = _round_up(H, th)
    if Hp != H:
        # Zero-pad the hidden dim: padded columns give h=0, b=0, gelu(0)=0 and
        # multiply zero-padded W_proj rows, so they contribute nothing.
        w_fc = jnp.pad(w_fc, ((0, 0), (0, Hp - H)))
        b_fc2 = jnp.pad(b_fc2, ((0, 0), (0, Hp - H)))
        w_proj = jnp.pad(w_proj, ((0, Hp - H), (0, 0)))

    scratch = [] if acc_into_out else [pltpu.VMEM((tm, E), jnp.float32)]

    out2d = pl.pallas_call(
        _make_streaming_kernel(acc_into_out, precision),
        out_shape=jax.ShapeDtypeStruct((Mp, E), out_dtype),
        grid_spec=pltpu.PrefetchScalarGridSpec(
            num_scalar_prefetch=0,
            grid=(Mp // tm, Hp // th),
            in_specs=[
                pl.BlockSpec((tm, E), lambda i, j: (i, 0)),    # x rows
                pl.BlockSpec((E, th), lambda i, j: (0, j)),    # W_fc chunk
                pl.BlockSpec((1, th), lambda i, j: (0, j)),    # b_fc chunk
                pl.BlockSpec((th, E), lambda i, j: (j, 0)),    # W_proj chunk
                pl.BlockSpec((1, E), lambda i, j: (0, 0)),     # b_proj
            ],
            out_specs=pl.BlockSpec((tm, E), lambda i, j: (i, 0)),
            scratch_shapes=scratch,
        ),
        compiler_params=pltpu.CompilerParams(
            dimension_semantics=("parallel", "arbitrary"),
            vmem_limit_bytes=budget,
        ),
    )(x2d, w_fc, b_fc2, w_proj, b_proj2)
    return out2d[:M].reshape(B, T, E)


def mlp_reference(x, w_fc, b_fc, w_proj, b_proj):
    h = jnp.einsum("bte,eh->bth", x, w_fc) + b_fc
    g = _gelu_tanh(h)
    return jnp.einsum("bth,he->bte", g, w_proj) + b_proj


if __name__ == "__main__":
    # Small config: batch=2, seq=8, n_embd=32 -> hidden=128
    B, T, E = 2, 8, 32
    H = 4 * E

    key = jax.random.PRNGKey(0)
    kx, kw1, kb1, kw2, kb2 = jax.random.split(key, 5)

    x = jax.random.normal(kx, (B, T, E), dtype=jnp.float32)

    # Deterministic parameter init (nn.Linear default-style uniform bounds).
    bound_fc = 1.0 / math.sqrt(E)
    bound_proj = 1.0 / math.sqrt(H)
    # Stored as (in, out), i.e. the transpose of PyTorch's (out, in) weight.
    w_fc = jax.random.uniform(kw1, (E, H), jnp.float32, -bound_fc, bound_fc)
    b_fc = jax.random.uniform(kb1, (H,), jnp.float32, -bound_fc, bound_fc)
    w_proj = jax.random.uniform(kw2, (H, E), jnp.float32, -bound_proj, bound_proj)
    b_proj = jax.random.uniform(kb2, (E,), jnp.float32, -bound_proj, bound_proj)

    ref = mlp_reference(x, w_fc, b_fc, w_proj, b_proj)

    # 1) Strict f32 path (resident weights, Precision.HIGHEST matmuls).
    out_f32 = jax.block_until_ready(
        mlp_forward(x, w_fc, b_fc, w_proj, b_proj, compute_dtype=jnp.float32))
    assert out_f32.shape == (B, T, E)
    assert jnp.allclose(out_f32, ref, atol=1e-5, rtol=1e-5), "f32 mismatch"

    # 2) Default bf16-MXU path (the one you'd run on v5e/v6e/v7x).
    out_bf16 = jax.block_until_ready(mlp_forward(x, w_fc, b_fc, w_proj, b_proj))
    assert out_bf16.shape == (B, T, E)
    assert jnp.allclose(out_bf16, ref, atol=5e-2, rtol=5e-2), "bf16 mismatch"

    # 3) Exercise the streaming (large-model) path: f32 output accumulates
    #    directly into the revisited output block (no scratch).
    out_stream = jax.block_until_ready(
        mlp_forward(x, w_fc, b_fc, w_proj, b_proj, force_stream=True))
    assert jnp.allclose(out_stream, ref, atol=5e-2, rtol=5e-2), "stream mismatch"

    # 4) Streaming path with non-f32 output dtype (uses the f32 accumulator
    #    scratch variant).
    out_stream_bf16 = jax.block_until_ready(
        mlp_forward(x.astype(jnp.bfloat16), w_fc, b_fc, w_proj, b_proj,
                    force_stream=True))
    assert jnp.allclose(out_stream_bf16.astype(jnp.float32), ref,
                        atol=7e-2, rtol=7e-2), "stream bf16 mismatch"

    print("KERNEL_OK")
</pallas_src>

<mosaic_0001>
module attributes {stable_mosaic.version = 11 : i64} {
  func.func @kernel(%arg0: i32, %arg1: memref<16x32xf32, #tpu.memory_space<vmem>>, %arg2: memref<32x128xf32, #tpu.memory_space<vmem>>, %arg3: memref<1x128xf32, #tpu.memory_space<vmem>>, %arg4: memref<128x32xf32, #tpu.memory_space<vmem>>, %arg5: memref<1x32xf32, #tpu.memory_space<vmem>>, %arg6: memref<16x32xf32, #tpu.memory_space<vmem>>) attributes {dimension_semantics = [#tpu.dimension_semantics<parallel>], iteration_bounds = array<i64: 1>, scalar_prefetch = 0 : i64, scratch_operands = 0 : i64, tpu.core_type = #tpu.core_type<tc>, window_params = [{transform_indices = @transform_0, window_bounds = array<i64: 16, 32>}, {pipeline_mode = #tpu.pipeline_mode<synchronous>, transform_indices = @transform_1, window_bounds = array<i64: 32, 128>}, {pipeline_mode = #tpu.pipeline_mode<synchronous>, transform_indices = @transform_2, window_bounds = array<i64: 1, 128>}, {pipeline_mode = #tpu.pipeline_mode<synchronous>, transform_indices = @transform_3, window_bounds = array<i64: 128, 32>}, {pipeline_mode = #tpu.pipeline_mode<synchronous>, transform_indices = @transform_4, window_bounds = array<i64: 1, 32>}, {transform_indices = @transform_5, window_bounds = array<i64: 16, 32>}]} {
    %c0 = arith.constant 0 : index
    %c0_0 = arith.constant 0 : index
    %0 = vector.load %arg1[%c0, %c0_0] : memref<16x32xf32, #tpu.memory_space<vmem>>, vector<16x32xf32>
    %c0_1 = arith.constant 0 : index
    %c0_2 = arith.constant 0 : index
    %1 = vector.load %arg2[%c0_1, %c0_2] : memref<32x128xf32, #tpu.memory_space<vmem>>, vector<32x128xf32>
    %cst = arith.constant dense<0.000000e+00> : vector<16x128xf32>
    %2 = tpu.matmul %0, %1, %cst {dimension_numbers = #tpu.dot_dimension_numbers<[1], [0], [0], [1], [0, 0, 1, 1], [], []>, precision = #tpu.contract_precision<fp32>} : vector<16x32xf32>, vector<32x128xf32>, vector<16x128xf32> -> vector<16x128xf32>
    %c0_3 = arith.constant 0 : index
    %c0_4 = arith.constant 0 : index
    %3 = vector.load %arg3[%c0_3, %c0_4] : memref<1x128xf32, #tpu.memory_space<vmem>>, vector<1x128xf32>
    %4 = vector.broadcast %3 : vector<1x128xf32> to vector<16x128xf32>
    %5 = arith.addf %2, %4 : vector<16x128xf32>
    %cst_5 = arith.constant 5.000000e-01 : f32
    %6 = vector.broadcast %cst_5 : f32 to vector<16x128xf32>
    %7 = arith.mulf %6, %5 : vector<16x128xf32>
    %cst_6 = arith.constant 4.471500e-02 : f32
    %8 = vector.broadcast %cst_6 : f32 to vector<16x128xf32>
    %9 = arith.mulf %8, %5 : vector<16x128xf32>
    %10 = arith.mulf %9, %5 : vector<16x128xf32>
    %11 = arith.mulf %10, %5 : vector<16x128xf32>
    %12 = arith.addf %5, %11 : vector<16x128xf32>
    %cst_7 = arith.constant 0.797884583 : f32
    %13 = vector.broadcast %cst_7 : f32 to vector<16x128xf32>
    %14 = arith.mulf %13, %12 : vector<16x128xf32>
    %15 = math.tanh %14 : vector<16x128xf32>
    %cst_8 = arith.constant 1.000000e+00 : f32
    %16 = vector.broadcast %cst_8 : f32 to vector<16x128xf32>
    %17 = arith.addf %16, %15 : vector<16x128xf32>
    %18 = arith.mulf %7, %17 : vector<16x128xf32>
    %c0_9 = arith.constant 0 : index
    %c0_10 = arith.constant 0 : index
    %19 = vector.load %arg4[%c0_9, %c0_10] : memref<128x32xf32, #tpu.memory_space<vmem>>, vector<128x32xf32>
    %cst_11 = arith.constant dense<0.000000e+00> : vector<16x32xf32>
    %20 = tpu.matmul %18, %19, %cst_11 {dimension_numbers = #tpu.dot_dimension_numbers<[1], [0], [0], [1], [0, 0, 1, 1], [], []>, precision = #tpu.contract_precision<fp32>} : vector<16x128xf32>, vector<128x32xf32>, vector<16x32xf32> -> vector<16x32xf32>
    %c0_12 = arith.constant 0 : index
    %c0_13 = arith.constant 0 : index
    %21 = vector.load %arg5[%c0_12, %c0_13] : memref<1x32xf32, #tpu.memory_space<vmem>>, vector<1x32xf32>
    %22 = vector.broadcast %21 : vector<1x32xf32> to vector<16x32xf32>
    %23 = arith.addf %20, %22 : vector<16x32xf32>
    %c0_14 = arith.constant 0 : index
    %c0_15 = arith.constant 0 : index
    %24 = vector.load %arg6[%c0_14, %c0_15] : memref<16x32xf32, #tpu.memory_space<vmem>>, vector<16x32xf32>
    tpu.vector_store %arg6[%c0_14, %c0_15], %23 {strides = array<i32>} : memref<16x32xf32, #tpu.memory_space<vmem>>, vector<16x32xf32>,
    return
  }
  func.func @transform_0(%arg0: i32) -> (i32, i32) {
    %c0_i32 = arith.constant 0 : i32
    %c0_i32_0 = arith.constant 0 : i32
    return %arg0, %c0_i32 : i32, i32
  }
  func.func @transform_1(%arg0: i32) -> (i32, i32) {
    %c0_i32 = arith.constant 0 : i32
    %c0_i32_0 = arith.constant 0 : i32
    %c0_i32_1 = arith.constant 0 : i32
    return %c0_i32, %c0_i32_0 : i32, i32
  }
  func.func @transform_2(%arg0: i32) -> (i32, i32) {
    %c0_i32 = arith.constant 0 : i32
    %c0_i32_0 = arith.constant 0 : i32
    %c0_i32_1 = arith.constant 0 : i32
    return %c0_i32, %c0_i32_0 : i32, i32
  }
  func.func @transform_3(%arg0: i32) -> (i32, i32) {
    %c0_i32 = arith.constant 0 : i32
    %c0_i32_0 = arith.constant 0 : i32
    %c0_i32_1 = arith.constant 0 : i32
    return %c0_i32, %c0_i32_0 : i32, i32
  }
  func.func @transform_4(%arg0: i32) -> (i32, i32) {
    %c0_i32 = arith.constant 0 : i32
    %c0_i32_0 = arith.constant 0 : i32
    %c0_i32_1 = arith.constant 0 : i32
    return %c0_i32, %c0_i32_0 : i32, i32
  }
  func.func @transform_5(%arg0: i32) -> (i32, i32) {
    %c0_i32 = arith.constant 0 : i32
    %c0_i32_0 = arith.constant 0 : i32
    return %arg0, %c0_i32 : i32, i32
  }
}

</mosaic_0001>

<bundles_post_ra>
// kernel: tpu_custom_call.1
= control target key start
LH: loop header
LB: loop body
LE: loop exit
PB: predicated region body
PF: predicated region fallthrough
CT: control target
= control target key end

     0   :  { %vm34_vm0 = vcmask 261120   ;;  %s2264_s0 = inlined_call_operand.vmem [shape: f32[16,32], index: 0, kind: input, shape index: {}]   ;;  %s2265_s1 = inlined_call_operand.vmem [shape: f32[32,128], index: 1, kind: input, shape index: {}]   ;;  %s2266_s2 = inlined_call_operand.vmem [shape: f32[1,128], index: 2, kind: input, shape index: {}]   ;;  %s2267_s3 = inlined_call_operand.vmem [shape: f32[128,32], index: 3, kind: input, shape index: {}]   ;;  %s2268_s4 = inlined_call_operand.vmem [shape: f32[1,32], index: 4, kind: input, shape index: {}]   ;;  %s2269_s5 = inlined_call_operand.hbm [shape: f32[16,32], index: 5, kind: output, shape index: {}]  }
   0x1   :  { %v26_v0 = vld [vmem:[%s2265_s1 + $0x18] sm:$0xff]  ;;  %v25_v1 = vld [vmem:[%s2265_s1 + $0x10] sm:$0xff]  ;;  %v24_v2 = vld [vmem:[%s2265_s1 + $0x8] sm:$0xff] }
   0x2   :  { %v1805_v3 = vand.u32 4294901760, %v26_v0  ;;  %v1807_v4 = vand.u32 4294901760, %v25_v1  ;;  %v1809_v5 = vand.u32 4294901760, %v24_v2  ;;  %v23_v6 = vld [vmem:[%s2265_s1] sm:$0xff]  ;;  %v22_v8 = vld [vmem:[%s2264_s0 + $0x8] sm:$0xff] }
   0x3   :  { %v21_v7 = vld [vmem:[%s2264_s0] sm:$0xff]  ;;  %v1820_v9 = vand.u32 4294901760, %v23_v6  ;;  %v39_v11 = vsel %vm34_vm0, %v22_v8, 0 }
   0x4   :  { %v36_v10 = vsel %vm34_vm0, %v21_v7, 0 }
   0x5   :  { %10 = vsyncpa [#allocation3], 0  ;;  %1458 = vmatprep.subr.mxu0 %v1805_v3  ;;  %v156_v12 = vsub.f32 %v26_v0, %v1805_v3  ;;  %v1826_v13 = vand.u32 4294901760, %v36_v10  ;;  %v163_v14 = vsub.f32 %v25_v1, %v1807_v4  ;;  %v1829_v15 = vand.u32 4294901760, %v39_v11  ;;  %v602_v38 = vld [vmem:[%s2267_s3 + $0x78] sm:$0xff]  ;;  %v601_v40 = vld [vmem:[%s2267_s3 + $0x70] sm:$0xff] }
   0x6   :  { %1459 = vmatpush3.msra.mxu0 %v1805_v3  ;;  %v170_v16 = vsub.f32 %v24_v2, %v1809_v5  ;;  %v177_v17 = vsub.f32 %v23_v6, %v1820_v9  ;;  %v1867_v39 = vand.u32 4294901760, %v602_v38  ;;  %v1875_v42 = vand.u32 4294901760, %v601_v40  ;;  %v600_v43 = vld [vmem:[%s2267_s3 + $0x68] sm:$0xff]  ;;  %v599_v47 = vld [vmem:[%s2267_s3 + $0x60] sm:$0xff]  ;;  %v598_v52 = vld [vmem:[%s2267_s3 + $0x58] sm:$0xff] }
   0x7   :  { %1460 = vmatprep.subr.mxu0 %v1807_v4  ;;  %v157_v18 = vand.u32 4294901760, %v156_v12  ;;  %v111_v19 = vsub.f32 %v36_v10, %v1826_v13  ;;  %v164_v20 = vand.u32 4294901760, %v163_v14  ;;  %v121_v21 = vsub.f32 %v39_v11, %v1829_v15  ;;  %1477 = vmatprep.mubr.f32.mxu1 %v1826_v13  ;;  %v597_v58 = vld [vmem:[%s2267_s3 + $0x50] sm:$0xff]  ;;  %v596_v0 = vld [vmem:[%s2267_s3 + $0x48] sm:$0xff]  ;;  %v595_v6 = vld [vmem:[%s2267_s3 + $0x40] sm:$0xff] }
   0x8   :  { %1461 = vmatpush3.msra.mxu0 %v1807_v4  ;;  %v171_v22 = vand.u32 4294901760, %v170_v16  ;;  %v178_v23 = vand.u32 4294901760, %v177_v17  ;;  %v1873_v41 = vsub.f32 %v602_v38, %v1867_v39  ;;  %v1886_v45 = vsub.f32 %v601_v40, %v1875_v42 }
   0x9   :  { %1462 = vmatprep.subr.mxu0 %v1809_v5  ;;  %v158_v24 = vsub.f32 %v156_v12, %v157_v18  ;;  %v112_v25 = vand.u32 4294901760, %v111_v19  ;;  %v165_v26 = vsub.f32 %v163_v14, %v164_v20  ;;  %v122_v27 = vand.u32 4294901760, %v121_v21 }
   0xa   :  { %1463 = vmatpush3.msra.mxu0 %v1809_v5  ;;  %v172_v28 = vsub.f32 %v170_v16, %v171_v22  ;;  %v179_v29 = vsub.f32 %v177_v17, %v178_v23  ;;  %v1883_v44 = vand.u32 4294901760, %v1873_v41  ;;  %v1888_v46 = vand.u32 4294901760, %v600_v43 }
   0xb   :  { %1464 = vmatprep.subr.mxu0 %v1820_v9  ;;  %v159_v30 = vand.u32 4294901760, %v158_v24  ;;  %v113_v31 = vsub.f32 %v111_v19, %v112_v25  ;;  %v166_v32 = vand.u32 4294901760, %v165_v26  ;;  %v123_v33 = vsub.f32 %v121_v21, %v122_v27  ;;  %v592_v24 = vld [vmem:[%s2267_s3 + $0x28] sm:$0xff] }
   0xc   :  { %1465 = vmatpush3.msra.mxu0 %v1820_v9  ;;  %v173_v36 = vand.u32 4294901760, %v172_v28  ;;  %v180_v37 = vand.u32 4294901760, %v179_v29  ;;  %v715_v48 = vsub.f32 %v1873_v41, %v1883_v44  ;;  %v1898_v49 = vand.u32 4294901760, %v1886_v45 }
   0xd   :  { %1469 = vmatprep.subr.mxu1 %v159_v30  ;;  %v114_v34 = vand.u32 4294901760, %v113_v31  ;;  %1480 = vmatprep.subr.mxu0 %v156_v12  ;;  %v124_v35 = vand.u32 4294901760, %v123_v33  ;;  %v1901_v50 = vsub.f32 %v600_v43, %v1888_v46  ;;  %v1903_v51 = vand.u32 4294901760, %v599_v47 }
   0xe   :  { %1470 = vmatpush3.msra.mxu1 %v159_v30  ;;  %v716_v53 = vand.u32 4294901760, %v715_v48  ;;  %v722_v54 = vsub.f32 %v1886_v45, %v1898_v49  ;;  %v1919_v57 = vand.u32 4294901760, %v598_v52  ;;  %v1930_v62 = vand.u32 4294901760, %v597_v58  ;;  %v591_v30 = vld [vmem:[%s2267_s3 + $0x20] sm:$0xff] }
   0xf   :  { %1466 = vmatprep.mubr.f32.mxu0 %v114_v34  ;;  %1471 = vmatprep.subr.mxu1 %v166_v32  ;;  %v1913_v55 = vand.u32 4294901760, %v1901_v50  ;;  %v1916_v56 = vsub.f32 %v599_v47, %v1903_v51  ;;  %v1960_v10 = vand.u32 4294901760, %v595_v6  ;;  %v2004_v28 = vand.u32 4294901760, %v592_v24  ;;  %v587_v48 = vld [vmem:[%s2267_s3] sm:$0xff] }
  0x10   :  { %1467 = vmatmul.mubr.f32.vlgmr.msra.gmra.mxu0 %v124_v35  ;;  %1472 = vmatpush3.msra.mxu1 %v166_v32  ;;  %v723_v59 = vand.u32 4294901760, %v722_v54  ;;  %v1933_v63 = vsub.f32 %v598_v52, %v1919_v57  ;;  %v2019_v34 = vand.u32 4294901760, %v591_v30  ;;  %v590_v35 = vld [vmem:[%s2267_s3 + $0x18] sm:$0xff] }
  0x11   :  { %1481 = vmatpush3.msra.mxu0 %v156_v12  ;;  %1473 = vmatprep.subr.mxu1 %v173_v36  ;;  %v729_v60 = vsub.f32 %v1901_v50, %v1913_v55  ;;  %v1928_v61 = vand.u32 4294901760, %v1916_v56  ;;  %v594_v12 = vld [vmem:[%s2267_s3 + $0x38] sm:$0xff]  ;;  %v2017_v33 = vsub.f32 %v592_v24, %v2004_v28  ;;  %v2034_v40 = vand.u32 4294901760, %v590_v35 }
  0x12   :  { %1482 = vmatprep.subr.mxu0 %v163_v14  ;;  %1474 = vmatpush3.msra.mxu1 %v173_v36  ;;  %v589_v36 = vld [vmem:[%s2267_s3 + $0x10] sm:$0xff]  ;;  %v2048_v54 = vsub.f32 %v591_v30, %v2019_v34 }
  0x13   :  { %1483 = vmatpush3.msra.mxu0 %v163_v14  ;;  %1475 = vmatprep.subr.mxu1 %v180_v37  ;;  %v730_v1 = vand.u32 4294901760, %v729_v60  ;;  %v736_v2 = vsub.f32 %v1916_v56, %v1928_v61  ;;  %v2036_v43 = vand.u32 4294901760, %v589_v36  ;;  %v2056_v60 = vsub.f32 %v590_v35, %v2034_v40 }
  0x14   :  { %1484 = vmatprep.subr.mxu0 %v170_v16  ;;  %1476 = vmatpush3.msra.mxu1 %v180_v37  ;;  %v588_v37 = vld [vmem:[%s2267_s3 + $0x8] sm:$0xff] }
  0x15   :  { %1485 = vmatpush3.msra.mxu0 %v170_v16  ;;  %1478 = vmatmul.mubr.f32.vlgmr.msra.gmra.mxu1 %v1829_v15  ;;  %v737_v7 = vand.u32 4294901760, %v736_v2  ;;  %v1977_v16 = vand.u32 4294901760, %v594_v12  ;;  %v2039_v47 = vand.u32 4294901760, %v588_v37 }
  0x16   :  { %1486 = vmatprep.subr.mxu0 %v177_v17  ;;  %1491 = vmatprep.subr.mxu1 %v1805_v3 }
  0x17   :  { %1487 = vmatpush3.msra.mxu0 %v177_v17  ;;  %1488 = vmatprep.mubr.f32.mxu0 %v111_v19 }
  0x18   :  { %1492 = vmatpush3.msra.mxu1 %v1805_v3  ;;  %1489 = vmatmul.mubr.f32.vlgmr.msra.gmra.mxu0 %v121_v21 }
  0x19   :  { %1493 = vmatprep.subr.mxu1 %v1807_v4  ;;  %1502 = vmatprep.subr.mxu0 %v157_v18 }
  0x1a   :  { %1494 = vmatpush3.msra.mxu1 %v1807_v4  ;;  %1503 = vmatpush3.msra.mxu0 %v157_v18  ;;  %v593_v18 = vld [vmem:[%s2267_s3 + $0x30] sm:$0xff] }
  0x1b   :  { %1495 = vmatprep.subr.mxu1 %v1809_v5  ;;  %1504 = vmatprep.subr.mxu0 %v164_v20 }
  0x1c   :  { %1496 = vmatpush3.msra.mxu1 %v1809_v5  ;;  %1505 = vmatpush3.msra.mxu0 %v164_v20 }
  0x1d   :  { %1497 = vmatprep.subr.mxu1 %v1820_v9  ;;  %1506 = vmatprep.subr.mxu0 %v171_v22 }
  0x1e   :  { %1498 = vmatpush3.msra.mxu1 %v1820_v9  ;;  %1499 = vmatprep.mubr.f32.mxu1 %v112_v25 }
  0x1f   :  { %1507 = vmatpush3.msra.mxu0 %v171_v22  ;;  %1500 = vmatmul.mubr.f32.vlgmr.msra.gmra.mxu1 %v122_v27  ;;  %v1990_v22 = vsub.f32 %v594_v12, %v1977_v16  ;;  %v2074_v12 = vand.u32 4294901760, %v2056_v60 }
  0x20   :  { %1508 = vmatprep.subr.mxu0 %v178_v23  ;;  %1513 = vmatprep.subr.mxu1 %v1805_v3 }
  0x21   :  { %1509 = vmatpush3.msra.mxu0 %v178_v23  ;;  %1510 = vmatprep.mubr.f32.mxu0 %v1826_v13  ;;  %v1993_v23 = vand.u32 4294901760, %v593_v18  ;;  %v2002_v27 = vand.u32 4294901760, %v1990_v22  ;;  %2293 = vst [vmem:[#allocation10_spill] sm:$0xff] %v2074_v12 }
  0x22   :  { %1514 = vmatpush3.msra.mxu1 %v1805_v3  ;;  %1511 = vmatmul.mubr.f32.vlgmr.msra.gmra.mxu0 %v1829_v15  ;;  %v1942_v3 = vsub.f32 %v597_v58, %v1930_v62  ;;  %v2051_v58 = vand.u32 4294901760, %v587_v48 }
  0x23   :  { %1515 = vmatprep.subr.mxu1 %v1807_v4  ;;  %1521 = vmatprep.mubr.f32.mxu1 %v1826_v13  ;;  %2289 = vst [vmem:[#allocation6_spill] sm:$0xff] %v2002_v27  ;;  %v2008_v29 = vsub.f32 %v593_v18, %v1993_v23  ;;  %v771_v32 = vsub.f32 %v1990_v22, %v2002_v27 }
  0x24   :  { %1516 = vmatpush3.msra.mxu1 %v1807_v4  ;;  %1524 = vmatprep.subr.mxu0 %v1867_v39  ;;  %v1944_v4 = vand.u32 4294901760, %v596_v0  ;;  %v1955_v8 = vand.u32 4294901760, %v1942_v3 }
  0x25   :  { %1517 = vmatprep.subr.mxu1 %v1809_v5  ;;  %1525 = vmatpush3.msra.mxu0 %v1867_v39  ;;  %v2032_v38 = vand.u32 4294901760, %v2008_v29  ;;  %v772_v52 = vand.u32 4294901760, %v771_v32 }
  0x26   :  { %1518 = vmatpush3.msra.mxu1 %v1809_v5  ;;  %1526 = vmatprep.subr.mxu0 %v1875_v42  ;;  %v1948_v5 = vand.u32 4294901760, %v1933_v63  ;;  %v750_v13 = vsub.f32 %v1942_v3, %v1955_v8 }
  0x27   :  { %1519 = vmatprep.subr.mxu1 %v1820_v9  ;;  %1527 = vmatpush3.msra.mxu0 %v1875_v42  ;;  %2290 = vst [vmem:[#allocation7_spill] sm:$0xff] %v2032_v38 }
  0x28   :  { %1520 = vmatpush3.msra.mxu1 %v1820_v9  ;;  %1528 = vmatprep.subr.mxu0 %v1888_v46  ;;  %v1958_v9 = vsub.f32 %v596_v0, %v1944_v4  ;;  %v743_v11 = vsub.f32 %v1933_v63, %v1948_v5  ;;  %v751_v19 = vand.u32 4294901760, %v750_v13  ;;  %v2059_v0 = vsub.f32 %v589_v36, %v2036_v43 }
  0x29   :  { %1522 = vmatmul.mubr.f32.vlgmr.msra.gmra.mxu1 %v1829_v15  ;;  %1529 = vmatpush3.msra.mxu0 %v1888_v46  ;;  %v1975_v15 = vsub.f32 %v595_v6, %v1960_v10  ;;  %v2067_v6 = vand.u32 4294901760, %v2048_v54 }
  0x2a   :  { %1530 = vmatprep.subr.mxu0 %v1903_v51  ;;  %1559 = vmatprep.subr.mxu1 %v716_v53  ;;  %v1972_v14 = vand.u32 4294901760, %v1958_v9  ;;  %v744_v17 = vand.u32 4294901760, %v743_v11  ;;  %v2077_v13 = vand.u32 4294901760, %v2059_v0 }
  0x2b   :  { %1531 = vmatpush3.msra.mxu0 %v1903_v51  ;;  %1560 = vmatpush3.msra.mxu1 %v716_v53  ;;  %v1987_v21 = vand.u32 4294901760, %v1975_v15  ;;  %v2045_v53 = vand.u32 4294901760, %v2017_v33  ;;  %2292 = vst [vmem:[#allocation9_spill] sm:$0xff] %v2067_v6 }
  0x2c   :  { %1532 = vmatprep.subr.mxu0 %v1919_v57  ;;  %1561 = vmatprep.subr.mxu1 %v723_v59  ;;  %v757_v20 = vsub.f32 %v1958_v9, %v1972_v14  ;;  %2294 = vst [vmem:[#allocation11_spill] sm:$0xff] %v2077_v13  ;;  %v806_v24 = vsub.f32 %v2059_v0, %v2077_v13 }
  0x2d   :  { %1533 = vmatpush3.msra.mxu0 %v1919_v57  ;;  %1562 = vmatpush3.msra.mxu1 %v723_v59  ;;  %2288 = vst [vmem:[#allocation5_spill] sm:$0xff] %v1987_v21  ;;  %v764_v26 = vsub.f32 %v1975_v15, %v1987_v21  ;;  %2291 = vst [vmem:[#allocation8_spill] sm:$0xff] %v2045_v53  ;;  %v778_v59 = vsub.f32 %v2008_v29, %v2032_v38 }
  0x2e   :  { %1534 = vmatprep.subr.mxu0 %v1930_v62  ;;  %1563 = vmatprep.subr.mxu1 %v730_v1  ;;  %v758_v25 = vand.u32 4294901760, %v757_v20  ;;  %v785_v2 = vsub.f32 %v2017_v33, %v2045_v53  ;;  %v799_v20 = vsub.f32 %v2056_v60, %v2074_v12  ;;  %v807_v32 = vand.u32 4294901760, %v806_v24 }
  0x2f   :  { %1535 = vmatpush3.msra.mxu0 %v1930_v62  ;;  %1564 = vmatpush3.msra.mxu1 %v730_v1  ;;  %v765_v31 = vand.u32 4294901760, %v764_v26  ;;  %v2062_v1 = vsub.f32 %v588_v37, %v2039_v47  ;;  %v779_v11 = vand.u32 4294901760, %v778_v59 }
  0x30   :  { %1536 = vmatprep.subr.mxu0 %v1944_v4  ;;  %1565 = vmatprep.subr.mxu1 %v737_v7  ;;  %v786_v18 = vand.u32 4294901760, %v785_v2  ;;  %v800_v30 = vand.u32 4294901760, %v799_v20 }
  0x31   :  { %1537 = vmatpush3.msra.mxu0 %v1944_v4  ;;  %1566 = vmatpush3.msra.mxu1 %v737_v7  ;;  %v2071_v7 = vsub.f32 %v587_v48, %v2051_v58 }
  0x32   :  { %1538 = vmatprep.subr.mxu0 %v1960_v10  ;;  %1567 = vmatprep.subr.mxu1 %v744_v17 }
  0x33   :  { %1539 = vmatpush3.msra.mxu0 %v1960_v10  ;;  %1568 = vmatpush3.msra.mxu1 %v744_v17  ;;  %v2080_v17 = vand.u32 4294901760, %v2062_v1 }
  0x34   :  { %1540 = vmatprep.subr.mxu0 %v1977_v16  ;;  %1569 = vmatprep.subr.mxu1 %v751_v19 }
  0x35   :  { %1541 = vmatpush3.msra.mxu0 %v1977_v16  ;;  %1570 = vmatpush3.msra.mxu1 %v751_v19  ;;  %2295 = vst [vmem:[#allocation12_spill] sm:$0xff] %v2080_v17  ;;  %v792_v19 = vsub.f32 %v2048_v54, %v2067_v6 }
  0x36   :  { %1542 = vmatprep.subr.mxu0 %v1993_v23  ;;  %1571 = vmatprep.subr.mxu1 %v758_v25 }
  0x37   :  { %1543 = vmatpush3.msra.mxu0 %v1993_v23  ;;  %1572 = vmatpush3.msra.mxu1 %v758_v25  ;;  %v2091_v25 = vand.u32 4294901760, %v2071_v7  ;;  %v793_v26 = vand.u32 4294901760, %v792_v19 }
  0x38   :  { %1544 = vmatprep.subr.mxu0 %v2004_v28  ;;  %1573 = vmatprep.subr.mxu1 %v765_v31 }
  0x39   :  { %1545 = vmatpush3.msra.mxu0 %v2004_v28  ;;  %1574 = vmatpush3.msra.mxu1 %v765_v31  ;;  %2296 = vst [vmem:[#allocation13_spill] sm:$0xff] %v2091_v25  ;;  %v813_v31 = vsub.f32 %v2062_v1, %v2080_v17  ;;  %v820_v35 = vsub.f32 %v2071_v7, %v2091_v25 }
  0x3a   :  { %1546 = vmatprep.subr.mxu0 %v2019_v34  ;;  %1575 = vmatprep.subr.mxu1 %v772_v52 }
  0x3b   :  { %1547 = vmatpush3.msra.mxu0 %v2019_v34  ;;  %1576 = vmatpush3.msra.mxu1 %v772_v52  ;;  %v814_v36 = vand.u32 4294901760, %v813_v31  ;;  %v821_v37 = vand.u32 4294901760, %v820_v35  ;;  %v1312_v52 = vld [vmem:[%s2266_s2] ss:$0 sm:$0xff] }
  0x3c   :  { %1548 = vmatprep.subr.mxu0 %v2034_v40  ;;  %1577 = vmatprep.subr.mxu1 %v779_v11 }
  0x3d   :  { %1549 = vmatpush3.msra.mxu0 %v2034_v40  ;;  %1578 = vmatpush3.msra.mxu1 %v779_v11 }
  0x3e   :  { %1550 = vmatprep.subr.mxu0 %v2036_v43  ;;  %1579 = vmatprep.subr.mxu1 %v786_v18 }
  0x3f   :  { %1551 = vmatpush3.msra.mxu0 %v2036_v43  ;;  %1580 = vmatpush3.msra.mxu1 %v786_v18 }
  0x40   :  { %1552 = vmatprep.subr.mxu0 %v2039_v47  ;;  %1581 = vmatprep.subr.mxu1 %v793_v26 }
  0x41   :  { %1553 = vmatpush3.msra.mxu0 %v2039_v47  ;;  %1582 = vmatpush3.msra.mxu1 %v793_v26 }
  0x42   :  { %1554 = vmatprep.subr.mxu0 %v2051_v58  ;;  %1583 = vmatprep.subr.mxu1 %v800_v30 }
  0x43   :  { %1555 = vmatpush3.msra.mxu0 %v2051_v58  ;;  %1584 = vmatpush3.msra.mxu1 %v800_v30 }
  0x44   :  { %1594 = vmatprep.subr.mxu0 %v1873_v41  ;;  %1585 = vmatprep.subr.mxu1 %v807_v32 }
  0x45   :  { %1586 = vmatpush3.msra.mxu1 %v807_v32 }
  0x46   :  { %1587 = vmatprep.subr.mxu1 %v814_v36 }
  0x47   :  { %1588 = vmatpush3.msra.mxu1 %v814_v36 }
  0x48   :  { %1589 = vmatprep.subr.mxu1 %v821_v37 }
  0x49   :  { %1590 = vmatpush3.msra.mxu1 %v821_v37 }
  0x4a   :  { %1629 = vmatprep.subr.mxu1 %v1867_v39 }
  0xd0   :  { %v1468_v48 = vpop.f32.mrf.mxu0 }
  0xd1   :  { %v127_v11 = vadd.f32 %v1468_v48, %v1312_v52 }
  0xd2   :  { %v116_v59 = vpop.f32.mrf.mxu0 }
  0xd3   :  { %v117_v18 = vadd.f32 %v1312_v52, %v116_v59 }
  0xd5   :  { %v1479_v2 = vpop.f32.mrf.mxu1 }
  0xd6   :  { %v224_v24 = vadd.f32 %v1479_v2, %v127_v11 }
  0xd7   :  { %v217_v19 = vpop.f32.mrf.mxu1 }
  0xd8   :  { %v1490_v20 = vpop.f32.mrf.mxu0  ;;  %v218_v30 = vadd.f32 %v217_v19, %v117_v18 }
  0xd9   :  { %v311_v32 = vadd.f32 %v1490_v20, %v224_v24 }
  0xda   :  { %v303_v31 = vpop.f32.mrf.mxu0 }
  0xdb   :  { %v304_v37 = vadd.f32 %v303_v31, %v218_v30 }
  0xdf   :  { %v1501_v26 = vpop.f32.mrf.mxu1 }
  0xe0   :  { %v396_v25 = vadd.f32 %v1501_v26, %v311_v32 }
  0xe1   :  { %v387_v35 = vpop.f32.mrf.mxu1 }
  0xe2   :  { %v1512_v36 = vpop.f32.mrf.mxu0  ;;  %v388_v17 = vadd.f32 %v387_v35, %v304_v37 }
  0xe3   :  { %v485_v12 = vadd.f32 %v1512_v36, %v396_v25 }
  0xe4   :  { %v478_v13 = vpop.f32.mrf.mxu0 }
  0xe5   :  { %v479_v53 = vadd.f32 %v478_v13, %v388_v17 }
  0xe9   :  { %v1523_v6 = vpop.f32.mrf.mxu1 }
  0xea   :  { %v566_v38 = vadd.f32 %v1523_v6, %v485_v12 }
  0xeb   :  { %v559_v27 = vpop.f32.mrf.mxu1 }
  0xec   :  { %v572_v48 = vmul.f32 0.044715, %v566_v38  ;;  %v560_v52 = vadd.f32 %v559_v27, %v479_v53  ;;  %v570_v31 = vmul.f32 0.5, %v566_v38 }
  0xee   :  { %v574_v59 = vmul.f32 %v572_v48, %v566_v38  ;;  %v571_v21 = vmul.f32 0.044715, %v560_v52  ;;  %v569_v13 = vmul.f32 0.5, %v560_v52 }
  0xf0   :  { %v576_v2 = vmul.f32 %v574_v59, %v566_v38  ;;  %v573_v11 = vmul.f32 %v571_v21, %v560_v52 }
  0xf2   :  { %v578_v18 = vadd.f32 %v576_v2, %v566_v38  ;;  %v575_v19 = vmul.f32 %v573_v11, %v560_v52 }
  0xf4   :  { %v580_v20 = vmul.f32 0.7978846, %v578_v18  ;;  %v577_v24 = vadd.f32 %v575_v19, %v560_v52 }
  0xf6   :  { %1737 = vtanh.f32 %v580_v20  ;;  %v579_v30 = vmul.f32 0.7978846, %v577_v24 }
  0xf8   :  { %1739 = vtanh.f32 %v579_v30 }
 0x103   :  { %v1738_v26 = vpop.eup %1737 }
 0x104   :  { %v584_v25 = vadd.f32 1.0, %v1738_v26 }
 0x105   :  { %v1740_v32 = vpop.eup %1739 }
 0x106   :  { %v583_v6 = vadd.f32 1.0, %v1740_v32  ;;  %v586_v12 = vmul.f32 %v584_v25, %v570_v31 }
 0x108   :  { %v585_v17 = vmul.f32 %v583_v6, %v569_v13  ;;  %v2109_v27 = vand.u32 4294901760, %v586_v12 }
 0x10a   :  { %v2111_v53 = vand.u32 4294901760, %v585_v17  ;;  %v2114_v21 = vsub.f32 %v586_v12, %v2109_v27 }
 0x10c   :  { %1591 = vmatprep.mubr.f32.mxu1 %v2111_v53  ;;  %v692_v35 = vsub.f32 %v585_v17, %v2111_v53  ;;  %v703_v36 = vand.u32 4294901760, %v2114_v21 }
 0x10d   :  { %1592 = vmatmul.mubr.f32.vlgmr.msra.gmra.mxu1 %v2109_v27 }
 0x10e   :  { %1630 = vmatpush3.msra.mxu1 %v1867_v39  ;;  %v693_v38 = vand.u32 4294901760, %v692_v35  ;;  %v704_v37 = vsub.f32 %v2114_v21, %v703_v36 }
 0x10f   :  { %1631 = vmatprep.subr.mxu1 %v1875_v42 }
 0x110   :  { %1632 = vmatpush3.msra.mxu1 %v1875_v42  ;;  %1661 = vmatprep.mubr.f32.mxu1 %v693_v38  ;;  %v694_v48 = vsub.f32 %v692_v35, %v693_v38  ;;  %v705_v59 = vand.u32 4294901760, %v704_v37 }
 0x111   :  { %1633 = vmatprep.subr.mxu1 %v1888_v46 }
 0x112   :  { %1634 = vmatpush3.msra.mxu1 %v1888_v46  ;;  %v695_v52 = vand.u32 4294901760, %v694_v48 }
 0x113   :  { %1635 = vmatprep.subr.mxu1 %v1903_v51 }
 0x114   :  { %1636 = vmatpush3.msra.mxu1 %v1903_v51  ;;  %1556 = vmatprep.mubr.f32.mxu0 %v695_v52 }
 0x115   :  { %1637 = vmatprep.subr.mxu1 %v1919_v57  ;;  %1557 = vmatmul.mubr.f32.vlgmr.msra.gmra.mxu0 %v705_v59 }
 0x116   :  { %1595 = vmatpush3.msra.mxu0 %v1873_v41  ;;  %1638 = vmatpush3.msra.mxu1 %v1919_v57  ;;  %v2298_v41 = vld [vmem:[#allocation6_spill] sm:$0xff] }
 0x117   :  { %1596 = vmatprep.subr.mxu0 %v1886_v45  ;;  %1626 = vmatprep.mubr.f32.mxu0 %v692_v35 }
 0x118   :  { %1639 = vmatprep.subr.mxu1 %v1930_v62  ;;  %1597 = vmatpush3.msra.mxu0 %v1886_v45  ;;  %v2301_v45 = vld [vmem:[#allocation9_spill] sm:$0xff] }
 0x119   :  { %1640 = vmatpush3.msra.mxu1 %v1930_v62  ;;  %1598 = vmatprep.subr.mxu0 %v1901_v50 }
 0x11a   :  { %1641 = vmatprep.subr.mxu1 %v1944_v4  ;;  %1599 = vmatpush3.msra.mxu0 %v1901_v50  ;;  %v2304_v50 = vld [vmem:[#allocation12_spill] sm:$0xff] }
 0x11b   :  { %1642 = vmatpush3.msra.mxu1 %v1944_v4  ;;  %1600 = vmatprep.subr.mxu0 %v1916_v56 }
 0x11c   :  { %1643 = vmatprep.subr.mxu1 %v1960_v10  ;;  %1601 = vmatpush3.msra.mxu0 %v1916_v56  ;;  %v1313_v56 = vld [vmem:[%s2268_s4] ss:$0 sm:$0xff]  ;;  %s1763_s4 = smov [#allocation2]  }
 0x11d   :  { %1644 = vmatpush3.msra.mxu1 %v1960_v10  ;;  %1602 = vmatprep.subr.mxu0 %v1933_v63  ;;  %s1301_s10 = sshll.u32 %s1763_s4, 4  ;;  %s1302_s10 = int_to_ptr.vmem [resolvable:$true] %s1301_s10 }
 0x11e   :  { %1645 = vmatprep.subr.mxu1 %v1977_v16  ;;  %1603 = vmatpush3.msra.mxu0 %v1933_v63  ;;  %s1741_s11 = scalar_lea.vmem %s1302_s10, 256  ;;  %p1746_p1 = scmp.lt.s32.totalorder %s1302_s10, %s1302_s10 }
 0x11f   :  { %1646 = vmatpush3.msra.mxu1 %v1977_v16  ;;  %1604 = vmatprep.subr.mxu0 %v1942_v3  ;;  %p1742_p0 = scmp.ne.s32.totalorder %s1302_s10, %s1741_s11  ;;  %p1747_p2 = scmp.lt.s32.totalorder %s1741_s11, %s1741_s11 }
 0x120   :  { %1647 = vmatprep.subr.mxu1 %v1993_v23  ;;  %1605 = vmatpush3.msra.mxu0 %v1942_v3 }
 0x121   :  { %1648 = vmatpush3.msra.mxu1 %v1993_v23  ;;  %1606 = vmatprep.subr.mxu0 %v1958_v9  ;;  %p1748_p3 = por %p1747_p2, %p1746_p1 }
 0x122   :  { %1649 = vmatprep.subr.mxu1 %v2004_v28  ;;  %1607 = vmatpush3.msra.mxu0 %v1958_v9 }
 0x123   :  { %1650 = vmatpush3.msra.mxu1 %v2004_v28  ;;  %1608 = vmatprep.subr.mxu0 %v1975_v15  ;;  %p1749_p4 = pnand %p1748_p3, %p1742_p0 }
 0x124   :  { %1651 = vmatprep.subr.mxu1 %v2019_v34  ;;  %1609 = vmatpush3.msra.mxu0 %v1975_v15 }
 0x125   :  { %1652 = vmatpush3.msra.mxu1 %v2019_v34  ;;  %1610 = vmatprep.subr.mxu0 %v1990_v22 }
 0x126   :  { %1653 = vmatprep.subr.mxu1 %v2034_v40  ;;  %1611 = vmatpush3.msra.mxu0 %v1990_v22 }
 0x127   :  { %1654 = vmatpush3.msra.mxu1 %v2034_v40  ;;  %1612 = vmatprep.subr.mxu0 %v2008_v29 }
 0x128   :  { %1655 = vmatprep.subr.mxu1 %v2036_v43  ;;  %1613 = vmatpush3.msra.mxu0 %v2008_v29 }
 0x129   :  { %1656 = vmatpush3.msra.mxu1 %v2036_v43  ;;  %1614 = vmatprep.subr.mxu0 %v2017_v33 }
 0x12a   :  { %1657 = vmatprep.subr.mxu1 %v2039_v47  ;;  %1615 = vmatpush3.msra.mxu0 %v2017_v33 }
 0x12b   :  { %1658 = vmatpush3.msra.mxu1 %v2039_v47  ;;  %1616 = vmatprep.subr.mxu0 %v2048_v54 }
 0x12c   :  { %1659 = vmatprep.subr.mxu1 %v2051_v58  ;;  %1617 = vmatpush3.msra.mxu0 %v2048_v54 }
 0x12d   :  { %1660 = vmatpush3.msra.mxu1 %v2051_v58  ;;  %1618 = vmatprep.subr.mxu0 %v2056_v60 }
 0x12e   :  { %1662 = vmatmul.mubr.f32.vlgmr.msra.gmra.mxu1 %v703_v36  ;;  %1699 = vmatprep.subr.mxu1 %v1867_v39 }
 0x12f   :  { %1619 = vmatpush3.msra.mxu0 %v2056_v60  ;;  %1700 = vmatpush3.msra.mxu1 %v1867_v39  ;;  %v2297_v39 = vld [vmem:[#allocation5_spill] sm:$0xff] }
 0x130   :  { %1731 = vmatprep.mubr.f32.mxu1 %v2111_v53  ;;  %1620 = vmatprep.subr.mxu0 %v2059_v0 }
 0x131   :  { %1701 = vmatprep.subr.mxu1 %v1875_v42  ;;  %1621 = vmatpush3.msra.mxu0 %v2059_v0 }
 0x132   :  { %1702 = vmatpush3.msra.mxu1 %v1875_v42  ;;  %1622 = vmatprep.subr.mxu0 %v2062_v1  ;;  %v2299_v42 = vld [vmem:[#allocation7_spill] sm:$0xff] }
 0x133   :  { %1703 = vmatprep.subr.mxu1 %v1888_v46  ;;  %1623 = vmatpush3.msra.mxu0 %v2062_v1 }
 0x134   :  { %1704 = vmatpush3.msra.mxu1 %v1888_v46  ;;  %1624 = vmatprep.subr.mxu0 %v2071_v7  ;;  %v2302_v46 = vld [vmem:[#allocation10_spill] sm:$0xff] }
 0x135   :  { %1705 = vmatprep.subr.mxu1 %v1903_v51  ;;  %1625 = vmatpush3.msra.mxu0 %v2071_v7 }
 0x136   :  { %1706 = vmatpush3.msra.mxu1 %v1903_v51  ;;  %1627 = vmatmul.mubr.f32.vlgmr.msra.gmra.mxu0 %v2114_v21  ;;  %v2305_v51 = vld [vmem:[#allocation13_spill] sm:$0xff] }
 0x137   :  { %1664 = vmatprep.subr.mxu0 %v1883_v44  ;;  %1707 = vmatprep.subr.mxu1 %v1919_v57 }
 0x138   :  { %1665 = vmatpush3.msra.mxu0 %v1883_v44  ;;  %1696 = vmatprep.mubr.f32.mxu0 %v2111_v53  ;;  %v2300_v44 = vld [vmem:[#allocation8_spill] sm:$0xff] }
 0x139   :  { %1708 = vmatpush3.msra.mxu1 %v1919_v57  ;;  %1666 = vmatprep.subr.mxu0 %v1898_v49 }
 0x13a   :  { %1709 = vmatprep.subr.mxu1 %v1930_v62  ;;  %1667 = vmatpush3.msra.mxu0 %v1898_v49  ;;  %v2303_v49 = vld [vmem:[#allocation11_spill] sm:$0xff] }
 0x13b   :  { %1710 = vmatpush3.msra.mxu1 %v1930_v62  ;;  %1668 = vmatprep.subr.mxu0 %v1913_v55 }
 0x13c   :  { %1711 = vmatprep.subr.mxu1 %v1944_v4  ;;  %1669 = vmatpush3.msra.mxu0 %v1913_v55 }
 0x13d   :  { %1712 = vmatpush3.msra.mxu1 %v1944_v4  ;;  %1670 = vmatprep.subr.mxu0 %v1928_v61 }
 0x13e   :  { %1713 = vmatprep.subr.mxu1 %v1960_v10  ;;  %1671 = vmatpush3.msra.mxu0 %v1928_v61 }
 0x13f   :  { %1714 = vmatpush3.msra.mxu1 %v1960_v10  ;;  %1672 = vmatprep.subr.mxu0 %v1948_v5 }
 0x140   :  { %1715 = vmatprep.subr.mxu1 %v1977_v16  ;;  %1673 = vmatpush3.msra.mxu0 %v1948_v5 }
 0x141   :  { %1716 = vmatpush3.msra.mxu1 %v1977_v16  ;;  %1674 = vmatprep.subr.mxu0 %v1955_v8 }
 0x142   :  { %1717 = vmatprep.subr.mxu1 %v1993_v23  ;;  %1675 = vmatpush3.msra.mxu0 %v1955_v8 }
 0x143   :  { %1718 = vmatpush3.msra.mxu1 %v1993_v23  ;;  %1676 = vmatprep.subr.mxu0 %v1972_v14 }
 0x144   :  { %1719 = vmatprep.subr.mxu1 %v2004_v28  ;;  %1677 = vmatpush3.msra.mxu0 %v1972_v14 }
 0x145   :  { %1720 = vmatpush3.msra.mxu1 %v2004_v28  ;;  %1678 = vmatprep.subr.mxu0 %v2297_v39 }
 0x146   :  { %1721 = vmatprep.subr.mxu1 %v2019_v34  ;;  %1679 = vmatpush3.msra.mxu0 %v2297_v39 }
 0x147   :  { %1722 = vmatpush3.msra.mxu1 %v2019_v34  ;;  %1680 = vmatprep.subr.mxu0 %v2298_v41 }
 0x148   :  { %1723 = vmatprep.subr.mxu1 %v2034_v40  ;;  %1681 = vmatpush3.msra.mxu0 %v2298_v41 }
 0x149   :  { %1724 = vmatpush3.msra.mxu1 %v2034_v40  ;;  %1682 = vmatprep.subr.mxu0 %v2299_v42 }
 0x14a   :  { %1725 = vmatprep.subr.mxu1 %v2036_v43  ;;  %1683 = vmatpush3.msra.mxu0 %v2299_v42 }
 0x14b   :  { %1726 = vmatpush3.msra.mxu1 %v2036_v43  ;;  %1684 = vmatprep.subr.mxu0 %v2300_v44 }
 0x14c   :  { %1727 = vmatprep.subr.mxu1 %v2039_v47  ;;  %1685 = vmatpush3.msra.mxu0 %v2300_v44 }
 0x14d   :  { %1728 = vmatpush3.msra.mxu1 %v2039_v47  ;;  %1686 = vmatprep.subr.mxu0 %v2301_v45 }
 0x14e   :  { %1729 = vmatprep.subr.mxu1 %v2051_v58  ;;  %1687 = vmatpush3.msra.mxu0 %v2301_v45 }
 0x14f   :  { %1730 = vmatpush3.msra.mxu1 %v2051_v58  ;;  %1688 = vmatprep.subr.mxu0 %v2302_v46 }
 0x150   :  { %1732 = vmatmul.mubr.f32.vlgmr.msra.gmra.mxu1 %v2109_v27  ;;  %1689 = vmatpush3.msra.mxu0 %v2302_v46 }
 0x151   :  { %1690 = vmatprep.subr.mxu0 %v2303_v49 }
 0x152   :  { %1691 = vmatpush3.msra.mxu0 %v2303_v49 }
 0x153   :  { %1692 = vmatprep.subr.mxu0 %v2304_v50 }
 0x154   :  { %1693 = vmatpush3.msra.mxu0 %v2304_v50 }
 0x155   :  { %1694 = vmatprep.subr.mxu0 %v2305_v51 }
 0x156   :  { %1695 = vmatpush3.msra.mxu0 %v2305_v51 }
 0x157   :  { %1697 = vmatmul.mubr.f32.vlgmr.msra.gmra.mxu0 %v2109_v27 }
 0x1cd   :  { %v1593_v57 = vpop.f32.mrf.mxu1 }
 0x1cf   :  { %v858_v4 = vpop.f32.mrf.mxu1 }
 0x1d5   :  { %v1558_v55 = vpop.f32.mrf.mxu0 }
 0x1d6   :  { %v708_v62 = vadd.f32 %v1558_v55, %v1313_v56 }
 0x1d7   :  { %v697_v61 = vpop.f32.mrf.mxu0 }
 0x1d8   :  { %v698_v3 = vadd.f32 %v1313_v56, %v697_v61  ;;  %v865_v5 = vadd.f32 %v1593_v57, %v708_v62 }
 0x1da   :  { %v859_v14 = vadd.f32 %v858_v4, %v698_v3 }
 0x1ee   :  { %v1663_v8 = vpop.f32.mrf.mxu1 }
 0x1f0   :  { %v1064_v16 = vpop.f32.mrf.mxu1 }
 0x1f6   :  { %v1628_v63 = vpop.f32.mrf.mxu0 }
 0x1f7   :  { %v976_v10 = vadd.f32 %v1628_v63, %v865_v5 }
 0x1f8   :  { %v968_v9 = vpop.f32.mrf.mxu0 }
 0x1f9   :  { %v969_v15 = vadd.f32 %v968_v9, %v859_v14  ;;  %v1073_v22 = vadd.f32 %v1663_v8, %v976_v10 }
 0x1fb   :  { %v1065_v33 = vadd.f32 %v1064_v16, %v969_v15 }
 0x210   :  { %v1733_v23 = vpop.f32.mrf.mxu1 }
 0x212   :  { %v1284_v47 = vpop.f32.mrf.mxu1 }
 0x217   :  { %v1698_v28 = vpop.f32.mrf.mxu0 }
 0x218   :  { %v1198_v29 = vadd.f32 %v1698_v28, %v1073_v22 }
 0x219   :  { %v1191_v34 = vpop.f32.mrf.mxu0 }
 0x21a   :  { %v1291_v40 = vadd.f32 %v1733_v23, %v1198_v29  ;;  %v1192_v43 = vadd.f32 %v1191_v34, %v1065_v33 }
 0x21c   :  { %1295 = vst.msk [vmem:[#allocation2 + $0x8] sm:$0xff] %vm34_vm0, %v1291_v40  ;;  %v1285_v54 = vadd.f32 %v1284_v47, %v1192_v43 }
 0x21e   :  { %1294 = vst.msk [vmem:[#allocation2] sm:$0xff] %vm34_vm0, %v1285_v54 }
 0x21f   :  { %1752 = shalt.err (!%p1749_p4)
}
 0x220   :  { %s1764_s12 = smov 128   ;;  %s1765_s13 = smov 8  }
 0x221   :  { %1307 = dma.vmem_to_hbm [thread:$0]  %s1302_s10, 256, %s2269_s5, [#allocation3], %s1764_s12, %s1764_s12, %s1765_s13  }
 0x222   :  { %1761 = dma.done.wait [#allocation3], 256  }
 0x223   :  { %1762 = vsyncadd [#allocation3], 4294967040 }
 0x224   :  { %1311 = vsyncpa [#allocation3], 1 }

</bundles_post_ra>
